<compile_context>
chip_gen: v7x
topology: tpu7x:2x2x1
jax: 0.10.0
libtpu: 0.0.40
codegen_flags: <defaults>
</compile_context>

<pallas_src>
import functools
import math

import numpy as np
import jax
import jax.numpy as jnp
from jax import lax
from jax.experimental import pallas as pl
from jax.experimental.pallas import tpu as pltpu

_EPS = 1e-5  # PyTorch GroupNorm default


# ---------------------------------------------------------------------------
# In-kernel GroupNorm on a (C, N) tile (channels on sublanes, spatial on lanes)
# ---------------------------------------------------------------------------
def _group_norm_cn(y, gamma_col, beta_col, masks, eps=_EPS):
    """masks: (C, G) one-hot group membership (channels grouped contiguously)."""
    c, n = y.shape
    groups = masks.shape[1]
    cnt = float((c // groups) * n)
    # pass 1: per-channel sums -> per-group mean broadcast back to channels
    row_sum = jnp.sum(y, axis=1, keepdims=True)                        # (C, 1)
    grp_sum = jnp.sum(masks * row_sum, axis=0, keepdims=True)          # (1, G)
    mean_col = jnp.sum(masks * grp_sum, axis=1, keepdims=True) / cnt   # (C, 1)
    # pass 2: centered sums of squares -> per-group variance
    cen = y - mean_col
    row_ss = jnp.sum(cen * cen, axis=1, keepdims=True)                 # (C, 1)
    grp_ss = jnp.sum(masks * row_ss, axis=0, keepdims=True)            # (1, G)
    var_col = jnp.sum(masks * grp_ss, axis=1, keepdims=True) / cnt     # (C, 1)
    return cen * (lax.rsqrt(var_col + eps) * gamma_col) + beta_col


# ---------------------------------------------------------------------------
# Pallas kernels
# ---------------------------------------------------------------------------
def _conv_gn_kernel(x_ref, w_ref, prm_ref, o_ref, *, num_groups):
    """GroupNorm(Conv1x1(x)) on one batch, (C_in, N) -> (C_out, N). Fallback path."""
    x = x_ref[0]                       # (C_in, N)
    w = w_ref[...]                     # (C_out, C_in)
    prm = prm_ref[...]                 # (C_out, 3+G): bias | gamma | beta | masks
    y = jnp.dot(w, x, preferred_element_type=jnp.float32) + prm[:, 0:1]
    y = _group_norm_cn(y, prm[:, 1:2], prm[:, 2:3], prm[:, 3:3 + num_groups])
    o_ref[0] = y.astype(o_ref.dtype)


def _gate_kernel(g_ref, xb_ref, wg_ref, wx_ref, prm_ref, sp_ref, o_ref, *,
                 num_groups, fuse_x_branch):
    """psi = sigmoid(GN1(wpsi . (relu(GN(Wg g)) + relu(x1)) + bpsi)), one batch.

    fuse_x_branch=True : xb is the strided x, x1 = GN(Wx xb + bx) in-kernel.
    fuse_x_branch=False: xb is a precomputed (already padded) x1.
    """
    g = g_ref[0]                       # (F_l, N)
    xb = xb_ref[0]                     # (F_g, N) or (F_int, N)
    prm = prm_ref[...]                 # (F_int, 7+G)
    sp = sp_ref[...]                   # (1, 3): b_psi, gamma_psi, beta_psi
    masks = prm[:, 7:7 + num_groups]

    # g branch: Conv1x1 + GroupNorm
    g1 = jnp.dot(wg_ref[...], g, preferred_element_type=jnp.float32) + prm[:, 0:1]
    g1 = _group_norm_cn(g1, prm[:, 1:2], prm[:, 2:3], masks)

    # x branch (fused when no equalize padding is required)
    if fuse_x_branch:
        x1 = jnp.dot(wx_ref[...], xb, preferred_element_type=jnp.float32) + prm[:, 3:4]
        x1 = _group_norm_cn(x1, prm[:, 4:5], prm[:, 5:6], masks)
    else:
        x1 = xb

    s = jnp.maximum(g1, 0.0) + jnp.maximum(x1, 0.0)       # relu(g1) + relu(x1)

    # psi conv: Conv3d(F_int -> 1, k=1) == per-channel weighted sublane reduce
    z = jnp.sum(prm[:, 6:7] * s, axis=0, keepdims=True) + sp[0:1, 0:1]   # (1, N)

    # GroupNorm(num_groups=1, num_channels=1): normalize over the whole map
    mu = jnp.mean(z)
    var = jnp.mean((z - mu) ** 2)
    z = (z - mu) * lax.rsqrt(var + _EPS) * sp[0:1, 1:2] + sp[0:1, 2:3]

    o_ref[0] = (1.0 / (1.0 + jnp.exp(-z))).astype(o_ref.dtype)          # sigmoid


def _upsample_gate_kernel(psi_ref, x_ref, md_ref, mhwT_ref, o_ref):
    """out = x * upsample2x(psi) for one batch, upsample done as two matmuls."""
    p = psi_ref[0]                                                      # (Dg, Hg*Wg)
    p = jnp.dot(p, mhwT_ref[...], preferred_element_type=jnp.float32)   # (Dg, 4HgWg)
    p = jnp.dot(md_ref[...], p, preferred_element_type=jnp.float32)     # (2Dg, 4HgWg)
    o_ref[0] = (x_ref[0] * p[None, :, :]).astype(o_ref.dtype)           # (F_g, 2Dg, 4HgWg)


# ---------------------------------------------------------------------------
# pallas_call wrappers (grid over batch, lane-dense blocks)
# ---------------------------------------------------------------------------
def _group_masks(c, groups):
    m = np.zeros((c, groups), np.float32)
    gs = c // groups
    for gi in range(groups):
        m[gi * gs:(gi + 1) * gs, gi] = 1.0
    return jnp.asarray(m)


def conv1x1_groupnorm_pallas(x_flat, w, bias, gamma, beta, num_groups):
    """x_flat: (b, C_in, N) f32 -> GroupNorm(Conv1x1(x)): (b, C_out, N) f32."""
    b, c_in, n = x_flat.shape
    c_out = w.shape[0]
    prm = jnp.concatenate(
        [jnp.stack([bias, gamma, beta], axis=1), _group_masks(c_out, num_groups)],
        axis=1).astype(jnp.float32)                          # (C_out, 3+G)
    kernel = functools.partial(_conv_gn_kernel, num_groups=num_groups)
    return pl.pallas_call(
        kernel,
        out_shape=jax.ShapeDtypeStruct((b, c_out, n), jnp.float32),
        grid_spec=pltpu.PrefetchScalarGridSpec(
            num_scalar_prefetch=0,
            grid=(b,),
            in_specs=[
                pl.BlockSpec((1, c_in, n), lambda i: (i, 0, 0)),
                pl.BlockSpec((c_out, c_in), lambda i: (0, 0)),
                pl.BlockSpec((c_out, 3 + num_groups), lambda i: (0, 0)),
            ],
            out_specs=pl.BlockSpec((1, c_out, n), lambda i: (i, 0, 0)),
        ),
        compiler_params=pltpu.CompilerParams(dimension_semantics=("parallel",)),
    )(x_flat.astype(jnp.float32), w.astype(jnp.float32), prm)


def attention_gate_pallas(g_flat, xb_flat, w_g, w_x, prm, sp, num_groups,
                          fuse_x_branch):
    """g_flat: (b, F_l, N), xb_flat: (b, C_xb, N) -> psi: (b, 1, N)."""
    b, f_l, n = g_flat.shape
    c_xb = xb_flat.shape[1]
    f_int = w_g.shape[0]
    kernel = functools.partial(_gate_kernel, num_groups=num_groups,
                               fuse_x_branch=fuse_x_branch)
    return pl.pallas_call(
        kernel,
        out_shape=jax.ShapeDtypeStruct((b, 1, n), jnp.float32),
        grid_spec=pltpu.PrefetchScalarGridSpec(
            num_scalar_prefetch=0,
            grid=(b,),
            in_specs=[
                pl.BlockSpec((1, f_l, n), lambda i: (i, 0, 0)),
                pl.BlockSpec((1, c_xb, n), lambda i: (i, 0, 0)),
                pl.BlockSpec((f_int, f_l), lambda i: (0, 0)),
                pl.BlockSpec((f_int, w_x.shape[1]), lambda i: (0, 0)),
                pl.BlockSpec((f_int, 7 + num_groups), lambda i: (0, 0)),
                pl.BlockSpec((1, 3), lambda i: (0, 0)),
            ],
            out_specs=pl.BlockSpec((1, 1, n), lambda i: (i, 0, 0)),
        ),
        compiler_params=pltpu.CompilerParams(dimension_semantics=("parallel",)),
    )(g_flat, xb_flat, w_g, w_x, prm, sp)


def upsample_gate_pallas(psi2, x4, md, mhw_t):
    """psi2: (b, Dg, Hg*Wg), x4: (b, F_g, 2Dg, 4*Hg*Wg) -> out = x * upsample(psi)."""
    b, dg, m = psi2.shape
    _, f_g, dx, mx = x4.shape
    return pl.pallas_call(
        _upsample_gate_kernel,
        out_shape=jax.ShapeDtypeStruct((b, f_g, dx, mx), jnp.float32),
        grid_spec=pltpu.PrefetchScalarGridSpec(
            num_scalar_prefetch=0,
            grid=(b,),
            in_specs=[
                pl.BlockSpec((1, dg, m), lambda i: (i, 0, 0)),
                pl.BlockSpec((1, f_g, dx, mx), lambda i: (i, 0, 0, 0)),
                pl.BlockSpec((dx, dg), lambda i: (0, 0)),
                pl.BlockSpec((m, mx), lambda i: (0, 0)),
            ],
            out_specs=pl.BlockSpec((1, f_g, dx, mx), lambda i: (i, 0, 0, 0)),
        ),
        compiler_params=pltpu.CompilerParams(dimension_semantics=("parallel",)),
    )(psi2, x4, md, mhw_t)


# ---------------------------------------------------------------------------
# Host-side helpers: interp matrices, equalize_dimensions pad, reference upsample
# ---------------------------------------------------------------------------
def _upsample_matrix_np(n_in):
    """(2*n_in, n_in) linear-interp matrix, align_corners=True."""
    n_out = 2 * n_in
    m = np.zeros((n_out, n_in), np.float32)
    if n_in == 1:
        m[:, 0] = 1.0
        return m
    scale = (n_in - 1) / (n_out - 1)
    for i in range(n_out):
        src = i * scale
        i0 = int(np.floor(src))
        i1 = min(i0 + 1, n_in - 1)
        w1 = src - i0
        m[i, i0] += 1.0 - w1
        m[i, i1] += w1
    return m


def upsample_trilinear_2x(p):
    """nn.Upsample(scale_factor=2, mode='trilinear', align_corners=True) (reference)."""
    _, _, dd, hh, ww = p.shape
    p = jnp.einsum('od,bcdhw->bcohw', jnp.asarray(_upsample_matrix_np(dd)), p)
    p = jnp.einsum('oh,bcdhw->bcdow', jnp.asarray(_upsample_matrix_np(hh)), p)
    p = jnp.einsum('ow,bcdhw->bcdho', jnp.asarray(_upsample_matrix_np(ww)), p)
    return p


def equalize_dimensions_jax(a, target_spatial):
    """Mirrors equalize_dimensions: zero-pad `a` by |size diff| per spatial dim."""
    d1 = abs(a.shape[-1] - target_spatial[-1]); l1 = d1 // 2; r1 = d1 - l1
    d2 = abs(a.shape[-2] - target_spatial[-2]); l2 = d2 // 2; r2 = d2 - l2
    d3 = abs(a.shape[-3] - target_spatial[-3]); l3 = d3 // 2; r3 = d3 - l3
    return jnp.pad(a, ((0, 0), (0, 0), (l3, r3), (l2, r2), (l1, r1)))


# ---------------------------------------------------------------------------
# Full Attention_block forward
# ---------------------------------------------------------------------------
def attention_block_forward(g, x, params, num_groups=4):
    (w_g, b_g, gamma_g, beta_g,
     w_x, b_x, gamma_x, beta_x,
     w_psi, b_psi, gamma_psi, beta_psi) = params

    b, f_l, dg, hg, wgs = g.shape
    _, f_g, dx, hx, wxs = x.shape
    f_int = w_g.shape[0]
    assert f_int % num_groups == 0, "GroupNorm requires F_int % num_groups == 0"
    assert (dx, hx, wxs) == (2 * dg, 2 * hg, 2 * wgs), (
        "final gating multiply requires x spatial dims == 2 * g spatial dims")

    n_g = dg * hg * wgs
    g_flat = g.reshape(b, f_l, n_g).astype(jnp.float32)

    # --- x branch: Conv3d(F_g->F_int, k=1, stride=2): stride-2 == subsample ----
    xs = x[:, :, ::2, ::2, ::2]
    d2, h2, w2 = xs.shape[2:]
    fuse_x_branch = (d2, h2, w2) == (dg, hg, wgs)   # equalize_dimensions is a no-op

    # Packed per-channel params: bg | gamma_g | beta_g | bx | gamma_x | beta_x | w_psi | masks
    prm = jnp.concatenate(
        [jnp.stack([b_g, gamma_g, beta_g, b_x, gamma_x, beta_x,
                    w_psi.reshape(f_int)], axis=1),
         _group_masks(f_int, num_groups)], axis=1).astype(jnp.float32)
    sp = jnp.stack([b_psi.reshape(()), gamma_psi.reshape(()),
                    beta_psi.reshape(())]).reshape(1, 3).astype(jnp.float32)

    if fuse_x_branch:
        xb_flat = xs.reshape(b, f_g, n_g).astype(jnp.float32)
    else:
        # Generic path (only hit for shape configs the module itself barely supports):
        # conv+GN kernel on the strided x, then equalize_dimensions zero-pad.
        x1_flat = conv1x1_groupnorm_pallas(
            xs.reshape(b, f_g, d2 * h2 * w2), w_x, b_x, gamma_x, beta_x, num_groups)
        x1 = equalize_dimensions_jax(x1_flat.reshape(b, f_int, d2, h2, w2),
                                     (dg, hg, wgs))
        assert x1.shape[2:] == (dg, hg, wgs), "equalize_dimensions produced a mismatch"
        xb_flat = x1.reshape(b, f_int, n_g)

    # --- fused gate: (x-branch conv+GN,) g-branch conv+GN, relu+relu, psi, sigmoid
    psi_flat = attention_gate_pallas(
        g_flat, xb_flat, w_g.astype(jnp.float32), w_x.astype(jnp.float32),
        prm, sp, num_groups, fuse_x_branch)                       # (b, 1, n_g)

    # --- trilinear 2x upsample (align_corners=True) fused with the gating mul --
    md = jnp.asarray(_upsample_matrix_np(dg))                     # (2Dg, Dg)
    mhw_t = jnp.asarray(
        np.ascontiguousarray(
            np.kron(_upsample_matrix_np(hg), _upsample_matrix_np(wgs)).T),
        jnp.float32)                                              # (Hg*Wg, 4*Hg*Wg)
    psi2 = psi_flat.reshape(b, dg, hg * wgs)                      # free relayout in XLA
    x4 = x.reshape(b, f_g, dx, hx * wxs).astype(jnp.float32)
    out4 = upsample_gate_pallas(psi2, x4, md, mhw_t)
    return out4.reshape(b, f_g, dx, hx, wxs)


# ---------------------------------------------------------------------------
# Pure-JAX reference (mirrors the PyTorch module) for a sanity check
# ---------------------------------------------------------------------------
def _reference_forward(g, x, params, num_groups=4):
    (w_g, b_g, gamma_g, beta_g, w_x, b_x, gamma_x, beta_x,
     w_psi, b_psi, gamma_psi, beta_psi) = params

    def conv1x1(y, w, bias):
        return jnp.einsum('oc,bcdhw->bodhw', w, y) + bias[None, :, None, None, None]

    def group_norm(y, gamma, beta, groups, eps=_EPS):
        b_, c, d, h, w_ = y.shape
        yg = y.reshape(b_, groups, -1)
        mu = yg.mean(axis=-1, keepdims=True)
        var = ((yg - mu) ** 2).mean(axis=-1, keepdims=True)
        yn = ((yg - mu) / jnp.sqrt(var + eps)).reshape(b_, c, d, h, w_)
        return yn * gamma[None, :, None, None, None] + beta[None, :, None, None, None]

    g1 = group_norm(conv1x1(g, w_g, b_g), gamma_g, beta_g, num_groups)
    x1 = group_norm(conv1x1(x[:, :, ::2, ::2, ::2], w_x, b_x), gamma_x, beta_x, num_groups)
    x1 = equalize_dimensions_jax(x1, g1.shape[-3:])
    s = jax.nn.relu(g1) + jax.nn.relu(x1)
    psi = jax.nn.sigmoid(group_norm(conv1x1(s, w_psi, b_psi), gamma_psi, beta_psi, 1))
    psi = upsample_trilinear_2x(psi)
    return x * psi


if __name__ == "__main__":
    key = jax.random.PRNGKey(0)
    ks = jax.random.split(key, 14)

    # Attention_block(F_g=8, F_l=8, F_int=8): g = gating signal (coarse grid),
    # x = skip connection at 2x spatial resolution.
    b, f_g, f_l, f_int = 2, 8, 8, 8
    dg = hg = wg_sp = 8
    dx = hx = wx_sp = 16

    g = jax.random.normal(ks[0], (b, f_l, dg, hg, wg_sp), jnp.float32)
    x = jax.random.normal(ks[1], (b, f_g, dx, hx, wx_sp), jnp.float32)

    def conv_init(kw, kb, c_out, c_in):
        bound = 1.0 / math.sqrt(c_in)   # torch Conv3d default init bound (k=1)
        w = jax.random.uniform(kw, (c_out, c_in), jnp.float32, -bound, bound)
        bias = jax.random.uniform(kb, (c_out,), jnp.float32, -bound, bound)
        return w, bias

    w_g, b_g = conv_init(ks[2], ks[3], f_int, f_l)
    w_x, b_x = conv_init(ks[4], ks[5], f_int, f_g)
    w_psi, b_psi = conv_init(ks[6], ks[7], 1, f_int)

    # GroupNorm affine params (randomized so the check exercises gamma/beta).
    gamma_g = 1.0 + 0.1 * jax.random.normal(ks[8], (f_int,), jnp.float32)
    beta_g = 0.1 * jax.random.normal(ks[9], (f_int,), jnp.float32)
    gamma_x = 1.0 + 0.1 * jax.random.normal(ks[10], (f_int,), jnp.float32)
    beta_x = 0.1 * jax.random.normal(ks[11], (f_int,), jnp.float32)
    gamma_psi = 1.0 + 0.1 * jax.random.normal(ks[12], (1,), jnp.float32)
    beta_psi = 0.1 * jax.random.normal(ks[13], (1,), jnp.float32)

    params = (w_g, b_g, gamma_g, beta_g, w_x, b_x, gamma_x, beta_x,
              w_psi, b_psi, gamma_psi, beta_psi)

    out = attention_block_forward(g, x, params)
    out = jax.block_until_ready(out)
    assert out.shape == x.shape

    ref = _reference_forward(g, x, params)
    np.testing.assert_allclose(np.asarray(out), np.asarray(ref),
                               rtol=1e-4, atol=1e-4)
    print("KERNEL_OK")
</pallas_src>

<mosaic_0001>
module attributes {stable_mosaic.version = 11 : i64} {
  func.func @_gate_kernel(%arg0: i32, %arg1: memref<1x8x512xf32, #tpu.memory_space<vmem>>, %arg2: memref<1x8x512xf32, #tpu.memory_space<vmem>>, %arg3: memref<8x8xf32, #tpu.memory_space<vmem>>, %arg4: memref<8x8xf32, #tpu.memory_space<vmem>>, %arg5: memref<8x11xf32, #tpu.memory_space<vmem>>, %arg6: memref<1x3xf32, #tpu.memory_space<vmem>>, %arg7: memref<1x1x512xf32, #tpu.memory_space<vmem>>) attributes {dimension_semantics = [#tpu.dimension_semantics<parallel>], iteration_bounds = array<i64: 2>, scalar_prefetch = 0 : i64, scratch_operands = 0 : i64, tpu.core_type = #tpu.core_type<tc>, window_params = [{transform_indices = @transform_0, window_bounds = array<i64: 1, 8, 512>}, {transform_indices = @transform_1, window_bounds = array<i64: 1, 8, 512>}, {pipeline_mode = #tpu.pipeline_mode<synchronous>, transform_indices = @transform_2, window_bounds = array<i64: 8, 8>}, {pipeline_mode = #tpu.pipeline_mode<synchronous>, transform_indices = @transform_3, window_bounds = array<i64: 8, 8>}, {pipeline_mode = #tpu.pipeline_mode<synchronous>, transform_indices = @transform_4, window_bounds = array<i64: 8, 11>}, {pipeline_mode = #tpu.pipeline_mode<synchronous>, transform_indices = @transform_5, window_bounds = array<i64: 1, 3>}, {transform_indices = @transform_6, window_bounds = array<i64: 1, 1, 512>}]} {
    %c0 = arith.constant 0 : index
    %c0_0 = arith.constant 0 : index
    %c0_1 = arith.constant 0 : index
    %0 = vector.load %arg1[%c0, %c0_0, %c0_1] : memref<1x8x512xf32, #tpu.memory_space<vmem>>, vector<1x8x512xf32>
    %1 = vector.shape_cast %0 : vector<1x8x512xf32> to vector<8x512xf32>
    %c0_2 = arith.constant 0 : index
    %c0_3 = arith.constant 0 : index
    %c0_4 = arith.constant 0 : index
    %2 = vector.load %arg2[%c0_2, %c0_3, %c0_4] : memref<1x8x512xf32, #tpu.memory_space<vmem>>, vector<1x8x512xf32>
    %3 = vector.shape_cast %2 : vector<1x8x512xf32> to vector<8x512xf32>
    %c0_5 = arith.constant 0 : index
    %c0_6 = arith.constant 0 : index
    %4 = vector.load %arg5[%c0_5, %c0_6] : memref<8x11xf32, #tpu.memory_space<vmem>>, vector<8x11xf32>
    %c0_7 = arith.constant 0 : index
    %c0_8 = arith.constant 0 : index
    %5 = vector.load %arg6[%c0_7, %c0_8] : memref<1x3xf32, #tpu.memory_space<vmem>>, vector<1x3xf32>
    %6 = vector.extract_strided_slice %4 {offsets = [0, 7], sizes = [8, 4], strides = [1, 1]} : vector<8x11xf32> to vector<8x4xf32>
    %c0_9 = arith.constant 0 : index
    %c0_10 = arith.constant 0 : index
    %7 = vector.load %arg3[%c0_9, %c0_10] : memref<8x8xf32, #tpu.memory_space<vmem>>, vector<8x8xf32>
    %cst = arith.constant dense<0.000000e+00> : vector<8x512xf32>
    %8 = tpu.matmul %7, %1, %cst {dimension_numbers = #tpu.dot_dimension_numbers<[1], [0], [0], [1], [0, 0, 1, 1], [], []>} : vector<8x8xf32>, vector<8x512xf32>, vector<8x512xf32> -> vector<8x512xf32>
    %9 = vector.extract_strided_slice %4 {offsets = [0, 0], sizes = [8, 1], strides = [1, 1]} : vector<8x11xf32> to vector<8x1xf32>
    %10 = vector.broadcast %9 : vector<8x1xf32> to vector<8x512xf32>
    %11 = arith.addf %8, %10 : vector<8x512xf32>
    %12 = vector.extract_strided_slice %4 {offsets = [0, 1], sizes = [8, 1], strides = [1, 1]} : vector<8x11xf32> to vector<8x1xf32>
    %13 = vector.extract_strided_slice %4 {offsets = [0, 2], sizes = [8, 1], strides = [1, 1]} : vector<8x11xf32> to vector<8x1xf32>
    %cst_11 = arith.constant dense<0.000000e+00> : vector<8xf32>
    %14 = vector.multi_reduction <add>, %11, %cst_11 [1] : vector<8x512xf32> to vector<8xf32>
    %15 = vector.shape_cast %14 : vector<8xf32> to vector<8x1xf32>
    %16 = vector.broadcast %15 : vector<8x1xf32> to vector<8x4xf32>
    %17 = arith.mulf %6, %16 : vector<8x4xf32>
    %cst_12 = arith.constant dense<0.000000e+00> : vector<4xf32>
    %18 = vector.multi_reduction <add>, %17, %cst_12 [0] : vector<8x4xf32> to vector<4xf32>
    %19 = vector.shape_cast %18 : vector<4xf32> to vector<1x4xf32>
    %20 = vector.broadcast %19 : vector<1x4xf32> to vector<8x4xf32>
    %21 = arith.mulf %6, %20 : vector<8x4xf32>
    %cst_13 = arith.constant dense<0.000000e+00> : vector<8xf32>
    %22 = vector.multi_reduction <add>, %21, %cst_13 [1] : vector<8x4xf32> to vector<8xf32>
    %23 = vector.shape_cast %22 : vector<8xf32> to vector<8x1xf32>
    %cst_14 = arith.constant 1.024000e+03 : f32
    %24 = vector.broadcast %cst_14 : f32 to vector<8x1xf32>
    %25 = arith.divf %23, %24 : vector<8x1xf32>
    %26 = vector.broadcast %25 : vector<8x1xf32> to vector<8x512xf32>
    %27 = arith.subf %11, %26 : vector<8x512xf32>
    %28 = arith.mulf %27, %27 : vector<8x512xf32>
    %cst_15 = arith.constant dense<0.000000e+00> : vector<8xf32>
    %29 = vector.multi_reduction <add>, %28, %cst_15 [1] : vector<8x512xf32> to vector<8xf32>
    %30 = vector.shape_cast %29 : vector<8xf32> to vector<8x1xf32>
    %31 = vector.broadcast %30 : vector<8x1xf32> to vector<8x4xf32>
    %32 = arith.mulf %6, %31 : vector<8x4xf32>
    %cst_16 = arith.constant dense<0.000000e+00> : vector<4xf32>
    %33 = vector.multi_reduction <add>, %32, %cst_16 [0] : vector<8x4xf32> to vector<4xf32>
    %34 = vector.shape_cast %33 : vector<4xf32> to vector<1x4xf32>
    %35 = vector.broadcast %34 : vector<1x4xf32> to vector<8x4xf32>
    %36 = arith.mulf %6, %35 : vector<8x4xf32>
    %cst_17 = arith.constant dense<0.000000e+00> : vector<8xf32>
    %37 = vector.multi_reduction <add>, %36, %cst_17 [1] : vector<8x4xf32> to vector<8xf32>
    %38 = vector.shape_cast %37 : vector<8xf32> to vector<8x1xf32>
    %cst_18 = arith.constant 1.024000e+03 : f32
    %39 = vector.broadcast %cst_18 : f32 to vector<8x1xf32>
    %40 = arith.divf %38, %39 : vector<8x1xf32>
    %cst_19 = arith.constant 9.99999974E-6 : f32
    %41 = vector.broadcast %cst_19 : f32 to vector<8x1xf32>
    %42 = arith.addf %40, %41 : vector<8x1xf32>
    %43 = math.rsqrt %42 : vector<8x1xf32>
    %44 = arith.mulf %43, %12 : vector<8x1xf32>
    %45 = vector.broadcast %44 : vector<8x1xf32> to vector<8x512xf32>
    %46 = arith.mulf %27, %45 : vector<8x512xf32>
    %47 = vector.broadcast %13 : vector<8x1xf32> to vector<8x512xf32>
    %48 = arith.addf %46, %47 : vector<8x512xf32>
    %c0_20 = arith.constant 0 : index
    %c0_21 = arith.constant 0 : index
    %49 = vector.load %arg4[%c0_20, %c0_21] : memref<8x8xf32, #tpu.memory_space<vmem>>, vector<8x8xf32>
    %cst_22 = arith.constant dense<0.000000e+00> : vector<8x512xf32>
    %50 = tpu.matmul %49, %3, %cst_22 {dimension_numbers = #tpu.dot_dimension_numbers<[1], [0], [0], [1], [0, 0, 1, 1], [], []>} : vector<8x8xf32>, vector<8x512xf32>, vector<8x512xf32> -> vector<8x512xf32>
    %51 = vector.extract_strided_slice %4 {offsets = [0, 3], sizes = [8, 1], strides = [1, 1]} : vector<8x11xf32> to vector<8x1xf32>
    %52 = vector.broadcast %51 : vector<8x1xf32> to vector<8x512xf32>
    %53 = arith.addf %50, %52 : vector<8x512xf32>
    %54 = vector.extract_strided_slice %4 {offsets = [0, 4], sizes = [8, 1], strides = [1, 1]} : vector<8x11xf32> to vector<8x1xf32>
    %55 = vector.extract_strided_slice %4 {offsets = [0, 5], sizes = [8, 1], strides = [1, 1]} : vector<8x11xf32> to vector<8x1xf32>
    %cst_23 = arith.constant dense<0.000000e+00> : vector<8xf32>
    %56 = vector.multi_reduction <add>, %53, %cst_23 [1] : vector<8x512xf32> to vector<8xf32>
    %57 = vector.shape_cast %56 : vector<8xf32> to vector<8x1xf32>
    %58 = vector.broadcast %57 : vector<8x1xf32> to vector<8x4xf32>
    %59 = arith.mulf %6, %58 : vector<8x4xf32>
    %cst_24 = arith.constant dense<0.000000e+00> : vector<4xf32>
    %60 = vector.multi_reduction <add>, %59, %cst_24 [0] : vector<8x4xf32> to vector<4xf32>
    %61 = vector.shape_cast %60 : vector<4xf32> to vector<1x4xf32>
    %62 = vector.broadcast %61 : vector<1x4xf32> to vector<8x4xf32>
    %63 = arith.mulf %6, %62 : vector<8x4xf32>
    %cst_25 = arith.constant dense<0.000000e+00> : vector<8xf32>
    %64 = vector.multi_reduction <add>, %63, %cst_25 [1] : vector<8x4xf32> to vector<8xf32>
    %65 = vector.shape_cast %64 : vector<8xf32> to vector<8x1xf32>
    %cst_26 = arith.constant 1.024000e+03 : f32
    %66 = vector.broadcast %cst_26 : f32 to vector<8x1xf32>
    %67 = arith.divf %65, %66 : vector<8x1xf32>
    %68 = vector.broadcast %67 : vector<8x1xf32> to vector<8x512xf32>
    %69 = arith.subf %53, %68 : vector<8x512xf32>
    %70 = arith.mulf %69, %69 : vector<8x512xf32>
    %cst_27 = arith.constant dense<0.000000e+00> : vector<8xf32>
    %71 = vector.multi_reduction <add>, %70, %cst_27 [1] : vector<8x512xf32> to vector<8xf32>
    %72 = vector.shape_cast %71 : vector<8xf32> to vector<8x1xf32>
    %73 = vector.broadcast %72 : vector<8x1xf32> to vector<8x4xf32>
    %74 = arith.mulf %6, %73 : vector<8x4xf32>
    %cst_28 = arith.constant dense<0.000000e+00> : vector<4xf32>
    %75 = vector.multi_reduction <add>, %74, %cst_28 [0] : vector<8x4xf32> to vector<4xf32>
    %76 = vector.shape_cast %75 : vector<4xf32> to vector<1x4xf32>
    %77 = vector.broadcast %76 : vector<1x4xf32> to vector<8x4xf32>
    %78 = arith.mulf %6, %77 : vector<8x4xf32>
    %cst_29 = arith.constant dense<0.000000e+00> : vector<8xf32>
    %79 = vector.multi_reduction <add>, %78, %cst_29 [1] : vector<8x4xf32> to vector<8xf32>
    %80 = vector.shape_cast %79 : vector<8xf32> to vector<8x1xf32>
    %cst_30 = arith.constant 1.024000e+03 : f32
    %81 = vector.broadcast %cst_30 : f32 to vector<8x1xf32>
    %82 = arith.divf %80, %81 : vector<8x1xf32>
    %cst_31 = arith.constant 9.99999974E-6 : f32
    %83 = vector.broadcast %cst_31 : f32 to vector<8x1xf32>
    %84 = arith.addf %82, %83 : vector<8x1xf32>
    %85 = math.rsqrt %84 : vector<8x1xf32>
    %86 = arith.mulf %85, %54 : vector<8x1xf32>
    %87 = vector.broadcast %86 : vector<8x1xf32> to vector<8x512xf32>
    %88 = arith.mulf %69, %87 : vector<8x512xf32>
    %89 = vector.broadcast %55 : vector<8x1xf32> to vector<8x512xf32>
    %90 = arith.addf %88, %89 : vector<8x512xf32>
    %cst_32 = arith.constant 0.000000e+00 : f32
    %91 = vector.broadcast %cst_32 : f32 to vector<8x512xf32>
    %92 = arith.maximumf %48, %91 : vector<8x512xf32>
    %cst_33 = arith.constant 0.000000e+00 : f32
    %93 = vector.broadcast %cst_33 : f32 to vector<8x512xf32>
    %94 = arith.maximumf %90, %93 : vector<8x512xf32>
    %95 = arith.addf %92, %94 : vector<8x512xf32>
    %96 = vector.extract_strided_slice %4 {offsets = [0, 6], sizes = [8, 1], strides = [1, 1]} : vector<8x11xf32> to vector<8x1xf32>
    %97 = vector.broadcast %96 : vector<8x1xf32> to vector<8x512xf32>
    %98 = arith.mulf %97, %95 : vector<8x512xf32>
    %cst_34 = arith.constant dense<0.000000e+00> : vector<512xf32>
    %99 = vector.multi_reduction <add>, %98, %cst_34 [0] : vector<8x512xf32> to vector<512xf32>
    %100 = vector.shape_cast %99 : vector<512xf32> to vector<1x512xf32>
    %101 = vector.extract_strided_slice %5 {offsets = [0, 0], sizes = [1, 1], strides = [1, 1]} : vector<1x3xf32> to vector<1x1xf32>
    %102 = vector.broadcast %101 : vector<1x1xf32> to vector<1x512xf32>
    %103 = arith.addf %100, %102 : vector<1x512xf32>
    %104 = vector.shape_cast %103 : vector<1x512xf32> to vector<1x1x512xf32>
    %cst_35 = arith.constant dense<0.000000e+00> : vector<1xf32>
    %105 = vector.multi_reduction <add>, %104, %cst_35 [1, 2] : vector<1x1x512xf32> to vector<1xf32>
    %106 = vector.shape_cast %105 : vector<1xf32> to vector<1x1x1xf32>
    %107 = vector.extract %106[0, 0, 0] : f32 from vector<1x1x1xf32>
    %cst_36 = arith.constant 5.120000e+02 : f32
    %108 = arith.divf %107, %cst_36 : f32
    %109 = vector.broadcast %108 : f32 to vector<1x512xf32>
    %110 = arith.subf %103, %109 : vector<1x512xf32>
    %111 = arith.mulf %110, %110 : vector<1x512xf32>
    %112 = vector.shape_cast %111 : vector<1x512xf32> to vector<1x1x512xf32>
    %cst_37 = arith.constant dense<0.000000e+00> : vector<1xf32>
    %113 = vector.multi_reduction <add>, %112, %cst_37 [1, 2] : vector<1x1x512xf32> to vector<1xf32>
    %114 = vector.shape_cast %113 : vector<1xf32> to vector<1x1x1xf32>
    %115 = vector.extract %114[0, 0, 0] : f32 from vector<1x1x1xf32>
    %cst_38 = arith.constant 5.120000e+02 : f32
    %116 = arith.divf %115, %cst_38 : f32
    %117 = vector.broadcast %108 : f32 to vector<1x512xf32>
    %118 = arith.subf %103, %117 : vector<1x512xf32>
    %cst_39 = arith.constant 9.99999974E-6 : f32
    %119 = arith.addf %116, %cst_39 : f32
    %120 = math.rsqrt %119 : f32
    %121 = vector.broadcast %120 : f32 to vector<1x512xf32>
    %122 = arith.mulf %118, %121 : vector<1x512xf32>
    %123 = vector.extract_strided_slice %5 {offsets = [0, 1], sizes = [1, 1], strides = [1, 1]} : vector<1x3xf32> to vector<1x1xf32>
    %124 = vector.broadcast %123 : vector<1x1xf32> to vector<1x512xf32>
    %125 = arith.mulf %122, %124 : vector<1x512xf32>
    %126 = vector.extract_strided_slice %5 {offsets = [0, 2], sizes = [1, 1], strides = [1, 1]} : vector<1x3xf32> to vector<1x1xf32>
    %127 = vector.broadcast %126 : vector<1x1xf32> to vector<1x512xf32>
    %128 = arith.addf %125, %127 : vector<1x512xf32>
    %cst_40 = arith.constant 0.000000e+00 : f32
    %129 = vector.broadcast %cst_40 : f32 to vector<1x512xf32>
    %130 = arith.subf %129, %128 : vector<1x512xf32>
    %131 = math.exp %130 : vector<1x512xf32>
    %cst_41 = arith.constant 1.000000e+00 : f32
    %132 = vector.broadcast %cst_41 : f32 to vector<1x512xf32>
    %133 = arith.addf %132, %131 : vector<1x512xf32>
    %cst_42 = arith.constant 1.000000e+00 : f32
    %134 = vector.broadcast %cst_42 : f32 to vector<1x512xf32>
    %135 = arith.divf %134, %133 : vector<1x512xf32>
    %c0_43 = arith.constant 0 : index
    %c0_44 = arith.constant 0 : index
    %c0_45 = arith.constant 0 : index
    %136 = vector.load %arg7[%c0_43, %c0_44, %c0_45] : memref<1x1x512xf32, #tpu.memory_space<vmem>>, vector<1x1x512xf32>
    %137 = vector.shape_cast %136 : vector<1x1x512xf32> to vector<1x512xf32>
    %138 = vector.shape_cast %135 : vector<1x512xf32> to vector<1x1x512xf32>
    tpu.vector_store %arg7[%c0_43, %c0_44, %c0_45], %138 {strides = array<i32>} : memref<1x1x512xf32, #tpu.memory_space<vmem>>, vector<1x1x512xf32>,
    return
  }
  func.func @transform_0(%arg0: i32) -> (i32, i32, i32) {
    %c0_i32 = arith.constant 0 : i32
    %c0_i32_0 = arith.constant 0 : i32
    %c0_i32_1 = arith.constant 0 : i32
    return %arg0, %c0_i32, %c0_i32_0 : i32, i32, i32
  }
  func.func @transform_1(%arg0: i32) -> (i32, i32, i32) {
    %c0_i32 = arith.constant 0 : i32
    %c0_i32_0 = arith.constant 0 : i32
    %c0_i32_1 = arith.constant 0 : i32
    return %arg0, %c0_i32, %c0_i32_0 : i32, i32, i32
  }
  func.func @transform_2(%arg0: i32) -> (i32, i32) {
    %c0_i32 = arith.constant 0 : i32
    %c0_i32_0 = arith.constant 0 : i32
    %c0_i32_1 = arith.constant 0 : i32
    return %c0_i32, %c0_i32_0 : i32, i32
  }
  func.func @transform_3(%arg0: i32) -> (i32, i32) {
    %c0_i32 = arith.constant 0 : i32
    %c0_i32_0 = arith.constant 0 : i32
    %c0_i32_1 = arith.constant 0 : i32
    return %c0_i32, %c0_i32_0 : i32, i32
  }
  func.func @transform_4(%arg0: i32) -> (i32, i32) {
    %c0_i32 = arith.constant 0 : i32
    %c0_i32_0 = arith.constant 0 : i32
    %c0_i32_1 = arith.constant 0 : i32
    return %c0_i32, %c0_i32_0 : i32, i32
  }
  func.func @transform_5(%arg0: i32) -> (i32, i32) {
    %c0_i32 = arith.constant 0 : i32
    %c0_i32_0 = arith.constant 0 : i32
    %c0_i32_1 = arith.constant 0 : i32
    return %c0_i32, %c0_i32_0 : i32, i32
  }
  func.func @transform_6(%arg0: i32) -> (i32, i32, i32) {
    %c0_i32 = arith.constant 0 : i32
    %c0_i32_0 = arith.constant 0 : i32
    %c0_i32_1 = arith.constant 0 : i32
    return %arg0, %c0_i32, %c0_i32_0 : i32, i32, i32
  }
}

</mosaic_0001>

<bundles_post_ra>
// kernel: tpu_custom_call.1
= control target key start
LH: loop header
LB: loop body
LE: loop exit
PB: predicated region body
PF: predicated region fallthrough
CT: control target
= control target key end

     0   :  { %s1882_s0 = inlined_call_operand.hbm [shape: f32[2,8,512], index: 0, kind: input, shape index: {}]   ;;  %s1883_s1 = inlined_call_operand.hbm [shape: f32[2,8,512], index: 1, kind: input, shape index: {}]   ;;  %s1884_s2 = inlined_call_operand.hbm [shape: f32[8,8], index: 2, kind: input, shape index: {}]   ;;  %s1885_s3 = inlined_call_operand.vmem [shape: f32[8,8], index: 3, kind: input, shape index: {}]   ;;  %s1886_s4 = inlined_call_operand.hbm [shape: f32[8,11], index: 4, kind: input, shape index: {}]   ;;  %s1887_s5 = inlined_call_operand.vmem [shape: f32[1,3], index: 5, kind: input, shape index: {}]   ;;  %s1888_s6 = inlined_call_operand.hbm [shape: f32[2,1,512], index: 6, kind: output, shape index: {}]  }
   0x1   :  { %1893 = sst [smem:[#allocation17_spill]] %s1884_s2 }
   0x2   :  { %1894 = sst [smem:[#allocation18_spill]] %s1886_s4 }
   0x3   :  { %11 = vsyncpa [#allocation3], 0 }
   0x4   :  { %13 = vsyncpa [#allocation3 + $0x1], 0 }
   0x5   :  { %14 = vsyncpa [#allocation6], 0 }
   0x6   :  { %16 = vsyncpa [#allocation6 + $0x1], 0 }
   0x7   :  { %17 = vsyncpa [#allocation9], 0 }
   0x8   :  { %18 = vsyncpa [#allocation4], 0 }
   0x9   :  { %20 = vsyncpa [#allocation4 + $0x1], 0  ;;  %s1508_s21 = smov 0   ;;  %s1510_s22 = smov 0  }
   0xa   :  { %s1512_s23 = smov 0   ;;  %s1514_s24 = smov 0  }
   0xb LB: > { %s1529_s25 = sadd.s32 4294967295, %s1456_s24   ;;  %s1113_s26 = sadd.s32 4294967294, %s1456_s24   ;;  %s1456_s24 = sphi %s1514_s24, %s1918_s24   ;;  %s1452_s23 = sphi %s1512_s23, %s1917_s23   ;;  %s1448_s22 = sphi %s1510_s22, %s1916_s22   ;;  %s1444_s21 = sphi %s1508_s21, %s1915_s21  }
   0xc   : > { %p46_p0 = scmp.ne.s32.totalorder %s1448_s22, %s1444_s21  ;;  %p1889_p1 = scmp.eq.s32.totalorder %s1529_s25, 0 }
   0xd   : > { %p186_p3 = scmp.eq.s32.totalorder %s1113_s26, 1  ;;  %p1114_p5 = scmp.ge.s32.totalorder %s1456_s24, 1 }
   0xe   : > { %p1538_p4 = por %p1889_p1, %p46_p0  ;;  %p193_p7 = scmp.lt.s32.totalorder %s1456_s24, 3 }
   0xf   : > { %p1543_p6 = por %p186_p3, %p46_p0  ;;  %s1458_s30 = smov [#allocation7]  }
  0x10   : > { %s1895_s27 = scalar_select %p1538_p4, 1, 0 }
  0x11   : > { %s1896_s28 = scalar_select %p1543_p6, 1, 0 }
  0x12   : > { %p1548_p8 = pnand %p1114_p5, %p193_p7  ;;  %s206_s7 = sshll.u32 %s1458_s30, 4  ;;  %s207_s7 = int_to_ptr.vmem [resolvable:$true] %s206_s7 }
  0x13   : > { %s1459_s8 = smov [#allocation8]   ;;  %s1564_s11 = sadd.s32 1, %s1456_s24  }
  0x14   : > { %s1897_s29 = scalar_select %p1548_p8, 1, 0 }
  0x15   : > { %p1162_p10 = pneg %p1548_p8  ;;  %s220_s9 = sshll.u32 %s1459_s8, 4  ;;  %s1561_s9 = int_to_ptr.vmem [resolvable:$true] %s220_s9 }
  0x16   : > { %s30_s12 = ssub.s32 %s1456_s24, %s1564_s11  ;;  %s1899_s2 = sld [smem:[#allocation17_spill]] }
  0x17   : > { %p1557_p11 = pnand %p1162_p10, %p1889_p1 }
  0x19   : > { %p1264_p13 = pneg %p1557_p11 }
  0x1c   : > { %s1262_s15 = scalar_lea.hbm %s1899_s2, 128 }
  0x1d   : > { %p1263_p12 = scmp.ne.s32.totalorder %s1899_s2, %s1262_s15  ;;  %p1269_p5 = scmp.lt.u32.totalorder %s1262_s15, %s1899_s2 }
  0x1f   : > { %p1265_p0 = pnand %p1264_p13, %p1263_p12 }
  0x21   : > { %p1266_p3 = pneg %p1265_p0 }
  0x23   : > { %p1271_p7 = pnand %p1269_p5, %p1266_p3 }
  0x25   : > { %1274 = shalt.err (!%p1271_p7)
}
  0x26   : > { %s1275_s20 = scalar_lea.vmem %s207_s7, 128  ;;  %p1283_p2 = scmp.lt.s32.totalorder %s207_s7, %s207_s7 }
  0x27   : > { %p1276_p10 = scmp.ne.s32.totalorder %s207_s7, %s1275_s20  ;;  %p1284_p6 = scmp.lt.s32.totalorder %s1275_s20, %s1275_s20 }
  0x29   : > { %p1278_p9 = pnand %p1276_p10, %p1264_p13  ;;  %p1285_p4 = por %p1284_p6, %p1283_p2 }
  0x2b   : > { %p1279_p1 = pneg %p1278_p9 }
  0x2d   : > { %p1286_p8 = pnand %p1285_p4, %p1279_p1 }
  0x2f   : > { %1289 = shalt.err (!%p1286_p8)
}
  0x30   : > { %1165 = dma.hbm_to_vmem [thread:$0]  (!%p1557_p11), %s1899_s2, 128, %s207_s7, [#allocation6]  }
  0x31   : > { %s1900_s4 = sld [smem:[#allocation18_spill]] }
  0x37   : > { %s1290_s14 = scalar_lea.hbm %s1900_s4, 128 }
  0x38   : > { %p1291_p9 = scmp.ne.s32.totalorder %s1900_s4, %s1290_s14  ;;  %p1297_p4 = scmp.lt.u32.totalorder %s1290_s14, %s1900_s4 }
  0x3a   : > { %p1293_p2 = pnand %p1291_p9, %p1264_p13 }
  0x3c   : > { %p1294_p1 = pneg %p1293_p2 }
  0x3e   : > { %p1299_p6 = pnand %p1297_p4, %p1294_p1 }
  0x40   : > { %1302 = shalt.err (!%p1299_p6)
}
  0x41   : > { %s1303_s7 = scalar_lea.vmem %s1561_s9, 128  ;;  %p1311_p3 = scmp.lt.s32.totalorder %s1561_s9, %s1561_s9 }
  0x42   : > { %p1304_p8 = scmp.ne.s32.totalorder %s1561_s9, %s1303_s7  ;;  %p1312_p5 = scmp.lt.s32.totalorder %s1303_s7, %s1303_s7 }
  0x44   : > { %p1306_p12 = pnand %p1304_p8, %p1264_p13  ;;  %p1313_p7 = por %p1312_p5, %p1311_p3 }
  0x46   : > { %p1307_p0 = pneg %p1306_p12 }
  0x48   : > { %p1314_p10 = pnand %p1313_p7, %p1307_p0 }
  0x4a   : > { %1317 = shalt.err (!%p1314_p10)
}
  0x4b   : > { %1168 = dma.hbm_to_vmem [thread:$0]  (!%p1557_p11), %s1900_s4, 128, %s1561_s9, [#allocation9]  }
  0x4c   : > { %p31_p13 = scmp.eq.s32.totalorder %s30_s12, 0  ;;  %s33_s26 = sadd.s32 1, %s1452_s23 }
  0x4d   : > { %p40_p9 = scmp.ne.s32.totalorder %s1452_s23, %s1448_s22  ;;  %p41_p2 = scmp.eq.s32.totalorder %s1456_s24, 0 }
  0x4e   : > { %s1623_s10 = scalar_select %p31_p13, %s1452_s23, %s33_s26  }
  0x4f   : > { %p42_p1 = por %p41_p2, %p40_p9  ;;  %p1902_p4 = scmp.eq.s32.totalorder %s1529_s25, 1 }
  0x50   : > { %1901 = sst [smem:[#allocation16_spill]] %s1623_s10  ;;  %p1182_p8 = scmp.lt.s32.totalorder %s1456_s24, 2 }
  0x51   : > { %p1627_p6 = por %p1902_p4, %p40_p9  ;;  %s234_s8 = sand.u32 1, %s1452_s23  }
  0x52   : > { %s1633_s13 = sshll.u32 %s234_s8, 5  ;;  %s1139_s9 = sshll.u32 %s1456_s24, 9 }
  0x53   : > { %s1903_s30 = scalar_select %p1627_p6, 1, 0 }
  0x54   : > { %s1639_s15 = scalar_lea.hbm %s1882_s0, %s1139_s9  ;;  %s238_s16 = scalar_lea.vmem [#allocation2], %s1633_s13 }
  0x55   : > { %s246_s17 = sshll.u32 %s238_s16, 4  ;;  %p1644_p11 = pnand %p1182_p8, %p42_p1  ;;  %s1642_s17 = int_to_ptr.vmem [resolvable:$true] %s246_s17 }
  0x56   : > { %s1651_s20 = scalar_lea.hbm %s1883_s1, %s1139_s9  ;;  %s253_s26 = sand.u32 1, %s1456_s24  }
  0x57   : > { %s235_s14 = scalar_lea.sflag [#allocation3], %s234_s8  ;;  %s1318_s12 = scalar_lea.hbm %s1639_s15, 512 }
  0x58   : > { %p1319_p12 = scmp.ne.s32.totalorder %s1639_s15, %s1318_s12  ;;  %p1320_p0 = pneg %p1644_p11 }
  0x59   : > { %s1323_s4 = scalar_lea.hbm %s1882_s0, 1024  ;;  %p1324_p7 = scmp.lt.u32.totalorder %s1639_s15, %s1882_s0 }
  0x5a   : > { %p1321_p3 = pnand %p1320_p0, %p1319_p12  ;;  %p1325_p10 = scmp.lt.u32.totalorder %s1323_s4, %s1318_s12 }
  0x5b   : > { %p1327_p9 = scmp.lt.u32.totalorder %s1318_s12, %s1639_s15 }
  0x5c   : > { %p1322_p5 = pneg %p1321_p3  ;;  %p1326_p13 = por %p1325_p10, %p1324_p7 }
  0x5e   : > { %p1328_p2 = por %p1327_p9, %p1326_p13 }
  0x60   : > { %p1329_p1 = pnand %p1328_p2, %p1322_p5 }
  0x62   : > { %1332 = shalt.err (!%p1329_p1)
}
  0x63   : > { %s1333_s8 = scalar_lea.vmem %s1642_s17, 512  ;;  %s1460_s2 = smov [#allocation2]  }
  0x64   : > { %p1334_p4 = scmp.ne.s32.totalorder %s1642_s17, %s1333_s8  ;;  %s1338_s9 = sshll.u32 %s1460_s2, 4  ;;  %s1339_s9 = int_to_ptr.vmem [resolvable:$false] %s1338_s9 }
  0x65   : > { %s1340_s10 = scalar_lea.vmem %s1339_s9, 1024  ;;  %p1341_p3 = scmp.lt.s32.totalorder %s1642_s17, %s1339_s9 }
  0x66   : > { %p1336_p8 = pnand %p1334_p4, %p1320_p0  ;;  %p1342_p7 = scmp.lt.s32.totalorder %s1340_s10, %s1333_s8 }
  0x68   : > { %p1337_p12 = pneg %p1336_p8  ;;  %p1343_p10 = por %p1342_p7, %p1341_p3 }
  0x6a   : > { %p1344_p13 = pnand %p1343_p10, %p1337_p12 }
  0x6c   : > { %1347 = shalt.err (!%p1344_p13)
}
  0x6d   : > { %1172 = dma.hbm_to_vmem [thread:$0]  (!%p1644_p11), %s1639_s15, 512, %s1642_s17, %s235_s14  }
  0x6e   : > { %s257_s4 = scalar_lea.vmem [#allocation5], %s1633_s13  ;;  %s254_s12 = scalar_lea.sflag [#allocation6], %s253_s26 }
  0x6f   : > { %s265_s19 = sshll.u32 %s257_s4, 4  ;;  %s1348_s16 = scalar_lea.hbm %s1651_s20, 512  ;;  %s266_s19 = int_to_ptr.vmem [resolvable:$true] %s265_s19 }
  0x70   : > { %p1349_p5 = scmp.ne.s32.totalorder %s1651_s20, %s1348_s16  ;;  %s1353_s2 = scalar_lea.hbm %s1883_s1, 1024 }
  0x71   : > { %p1354_p1 = scmp.lt.u32.totalorder %s1651_s20, %s1883_s1  ;;  %p1355_p4 = scmp.lt.u32.totalorder %s1353_s2, %s1348_s16 }
  0x72   : > { %p1351_p9 = pnand %p1349_p5, %p1320_p0  ;;  %p1357_p12 = scmp.lt.u32.totalorder %s1348_s16, %s1651_s20 }
  0x73   : > { %p1356_p8 = por %p1355_p4, %p1354_p1 }
  0x74   : > { %p1352_p2 = pneg %p1351_p9 }
  0x75   : > { %p1358_p3 = por %p1357_p12, %p1356_p8 }
  0x77   : > { %p1359_p7 = pnand %p1358_p3, %p1352_p2 }
  0x79   : > { %1362 = shalt.err (!%p1359_p7)
}
  0x7a   : > { %s1363_s13 = scalar_lea.vmem %s266_s19, 512  ;;  %s1461_s15 = smov [#allocation5]  }
  0x7b   : > { %p1364_p10 = scmp.ne.s32.totalorder %s266_s19, %s1363_s13  ;;  %s1368_s17 = sshll.u32 %s1461_s15, 4  ;;  %s1369_s17 = int_to_ptr.vmem [resolvable:$false] %s1368_s17 }
  0x7c   : > { %s1370_s26 = scalar_lea.vmem %s1369_s17, 1024  ;;  %p1371_p9 = scmp.lt.s32.totalorder %s266_s19, %s1369_s17 }
  0x7d   : > { %p1366_p13 = pnand %p1364_p10, %p1320_p0  ;;  %p1372_p6 = scmp.lt.s32.totalorder %s1370_s26, %s1363_s13 }
  0x7f   : > { %p1367_p5 = pneg %p1366_p13  ;;  %p1373_p1 = por %p1372_p6, %p1371_p9 }
  0x81   : > { %p1374_p4 = pnand %p1373_p1, %p1367_p5 }
  0x83   : > { %1377 = shalt.err (!%p1374_p4)
}
  0x84   : > { %1175 = dma.hbm_to_vmem [thread:$0]  (!%p1644_p11), %s1651_s20, 512, %s266_s19, %s254_s12  }
  0x85   : > { %p1905_p2 = scmp.ne.s32.totalorder %s1897_s29, 0 }
  0x86   : > { %s1704_s14 = sand.u32 (!%p1905_p2), 1, %s1448_s22   ;;  %p1906_p0 = scmp.ne.s32.totalorder (!%p1905_p2), %s1895_s27, 0 }
  0x87   : > { %274 = sbr.rel (%p1905_p2) target bundleno = 1954 (0x7a2), region = 44  ;;  %s1125_s4 = sshll.u32 (!%p1905_p2), %s1704_s14, 5 }
  0x88   : > { %s277_s16 = scalar_lea.sflag (!%p1905_p2), [#allocation3], %s1704_s14  ;;  %s280_s7 = scalar_lea.vmem (!%p1905_p2), [#allocation2], %s1125_s4 }
  0x8e   : > { %1423 = dma.done.wait (%p1906_p0), %s277_s16, 512  }
  0x8f   : > { %1425 = vsyncadd (%p1906_p0), %s277_s16, 4294966784  ;;  %s285_s18 = sand.u32 1, %s1529_s25   ;;  %s289_s29 = scalar_lea.vmem [#allocation5], %s1125_s4 }
  0x90   : > { %s286_s20 = scalar_lea.sflag [#allocation6], %s285_s18 }
  0x91   : > { %1427 = dma.done.wait (%p1906_p0), %s286_s20, 512  }
  0x92   : > { %1429 = vsyncadd (%p1906_p0), %s286_s20, 4294966784  ;;  %p1907_p6 = scmp.eq.s32.totalorder %s1529_s25, 0 }
  0x94   : > { %1431 = dma.done.wait (%p1907_p6), [#allocation6], 128   ;;  %p1908_p11 = pmov %p1907_p6 }
  0x95   : > { %p1909_p8 = pmov %p1907_p6 }
  0x96   : > { %1433 = vsyncadd (%p1908_p11), [#allocation6], 4294967168 }
  0x97   : > { %1435 = dma.done.wait (%p1909_p8), [#allocation9], 128   ;;  %p1910_p12 = pmov %p1907_p6 }
  0x98   : > { %v1462_v0 = vmov 0.0   ;;  %v1463_v1 = vmov 0   ;;  %v332_v2 = vld [vmem:[%s280_s7 + $0x8] sm:$0xff]  ;;  %v334_v3 = vld [vmem:[%s280_s7 + $0x18] sm:$0xff]  ;;  %v331_v4 = vld [vmem:[%s280_s7] sm:$0xff]  ;;  %vm347_vm0 = vcmask 64512  }
  0x99   : > { %1437 = vsyncadd (%p1910_p12), [#allocation9], 4294967168  ;;  %415 = vmatprep.mubr.f32.mxu0 %v1462_v0  ;;  %486 = vmatprep.mubr.f32.mxu1 %v1462_v0  ;;  %v333_v5 = vld [vmem:[%s280_s7 + $0x10] sm:$0xff]  ;;  %v341_v6 = vld [vmem:[#allocation7] sm:$0xff]  ;;  %v1464_v13 = vmov 3   ;;  %vm499_vm1 = vcmask 89144  }
  0x9a   : > { %1230 = vset.pattern.permute.xlu0 %v1463_v1  ;;  %351 = vmatprep.subr.mxu0 %v332_v2  ;;  %v336_v7 = vld [vmem:[%s289_s29 + $0x8] sm:$0xff]  ;;  %v335_v8 = vld [vmem:[%s289_s29] sm:$0xff]  ;;  %v338_v9 = vld [vmem:[%s289_s29 + $0x18] sm:$0xff]  ;;  %s1465_s12 = smov 121   ;;  %vm512_vm2 = vcmask 31744   ;;  %vm847_vm3 = vcmask 1040384  }
  0x9b   : > { %422 = vmatprep.subr.mxu1 %v334_v3  ;;  %352 = vmatpush1.msra.mxu0 %v331_v4  ;;  %v337_v10 = vld [vmem:[%s289_s29 + $0x10] sm:$0xff]  ;;  %v568_v11 = vld [vmem:[%s1885_s3] sm:$0xff]  ;;  %v1731_v12 = vld [vmem:[#allocation8] sm:$0xff]  ;;  %s1129_s4 = sshll.u32 %s1704_s14, 2  ;;  %s1141_s16 = sshll.u32 %s1529_s25, 6 }
  0x9c   : > { %423 = vmatpush1.msra.mxu1 %v333_v5  ;;  %1130 = vmatmul.mubr.msk.f32.vlgmr.msra.gmra.mrb[0].mxu0 %vm347_vm0, %v341_v6  ;;  %s330_s7 = scalar_lea.vmem [#allocation10], %s1129_s4  ;;  %s1838_s27 = scalar_lea.hbm %s1888_s6, %s1141_s16 }
  0x9d   : > { %1131 = vmatmul.mubr.msk.f32.vlgmr.msra.gmra.mrb[0].mxu1 %vm347_vm0, %v341_v6  ;;  %576 = vmatprep.subr.mxu0 %v336_v7  ;;  %s1001_s18 = sshll.u32 %s330_s7, 4  ;;  %s987_s19 = scalar_lea.sflag [#allocation4], %s1704_s14  ;;  %s1840_s18 = int_to_ptr.vmem [resolvable:$true] %s1001_s18 }
  0x9e   : > { %640 = vmatprep.mubr.f32.mxu0 %v1462_v0  ;;  %577 = vmatpush1.msra.mxu0 %v335_v8  ;;  %p1911_p7 = scmp.ne.s32.totalorder %s1903_s30, 0  ;;  %s1472_s25 = smov [#allocation10]  }
  0x9f   : > { %647 = vmatprep.subr.mxu1 %v338_v9  ;;  %711 = vmatprep.mubr.f32.mxu1 %v1462_v0  ;;  %s1382_s8 = sshll.u32 %s1472_s25, 4  ;;  %s1383_s8 = int_to_ptr.vmem [resolvable:$false] %s1382_s8 }
  0xa0   : > { %648 = vmatpush1.msra.mxu1 %v337_v10  ;;  %1132 = vmatmul.mubr.msk.f32.vlgmr.msra.gmra.mrb[2].mxu0 %vm347_vm0, %v568_v11  ;;  %s1384_s2 = scalar_lea.vmem %s1383_s8, 128  ;;  %p1385_p5 = scmp.lt.s32.totalorder %s1840_s18, %s1383_s8 }
  0xa1   : > { %1133 = vmatmul.mubr.msk.f32.vlgmr.msra.gmra.mrb[2].mxu1 %vm347_vm0, %v568_v11  ;;  %344 = vperm.xlu0 %1230, %v1731_v12  }
  0xa5   : > { %1231 = vset.pattern.permute.xlu0 %v1464_v13 }
  0xa6   : > { %570 = vperm.xlu0 %1231, %v1731_v12  }
 0x120   : > { %v345_v14 = vpop.permute.xlu0 %344 }
 0x125   : > { %v571_v21 = vpop.permute.xlu0 %570 }
 0x16f   : > { %v417_v15 = vpop.f32.mrb[0].mxu0 }
 0x170   : > { %v488_v16 = vpop.f32.mrb[0].mxu1  ;;  %v418_v17 = vadd.f32 %v417_v15, %v345_v14  ;;  %v419_v18 = vpop.f32.mrb[1].mxu0 }
 0x171   : > { %v490_v19 = vpop.f32.mrb[1].mxu1  ;;  %v420_v20 = vadd.f32 %v419_v18, %v345_v14  ;;  %v489_v25 = vadd.f32 %v488_v16, %v345_v14 }
 0x172   : > { %v491_v29 = vadd.f32 %v490_v19, %v345_v14 }
 0x173   : > { %v493_v22 = vadd.f32 %v420_v20, %v418_v17  ;;  %v642_v23 = vpop.f32.mrb[2].mxu0 }
 0x174   : > { %v713_v24 = vpop.f32.mrb[2].mxu1  ;;  %v643_v26 = vadd.f32 %v642_v23, %v571_v21  ;;  %v644_v27 = vpop.f32.mrb[3].mxu0 }
 0x175   : > { %v715_v28 = vpop.f32.mrb[3].mxu1  ;;  %v645_v30 = vadd.f32 %v644_v27, %v571_v21  ;;  %v494_v31 = vadd.f32 %v493_v22, %v489_v25  ;;  %v714_v33 = vadd.f32 %v713_v24, %v571_v21 }
 0x176   : > { %v716_v36 = vadd.f32 %v715_v28, %v571_v21 }
 0x177   : > { %v718_v32 = vadd.f32 %v645_v30, %v643_v26  ;;  %v495_v34 = vadd.f32 %v494_v31, %v491_v29 }
 0x179   : > { %v719_v35 = vadd.f32 %v718_v32, %v714_v33  ;;  %496 = vadd.xlane.f32.xlu1 %v495_v34 }
 0x17b   : > { %v720_v37 = vadd.f32 %v719_v35, %v716_v36 }
 0x17d   : > { %721 = vadd.xlane.f32.xlu1 %v720_v37 }
 0x206   : > { %v497_v38 = vpop.xlane.xlu1 %496 }
 0x207   : > { %v498_v39 = vmul.f32 %v497_v38, %v1731_v12 }
 0x209   : > { %v500_v40 = vsel %vm499_vm1, %v498_v39, 0.0 }
 0x20a   : > { %v501_v41 = vrot.slane %v500_v40, 4  ;;  %v722_v42 = vpop.xlane.xlu1 %721 }
 0x20b   : > { %v723_v43 = vmul.f32 %v722_v42, %v1731_v12 }
 0x20c   : > { %v502_v44 = vadd.f32 %v501_v41, %v500_v40 }
 0x20d   : > { %v724_v45 = vsel %vm499_vm1, %v723_v43, 0.0 }
 0x20e   : > { %v503_v46 = vrot.slane %v502_v44, 2  ;;  %v725_v47 = vrot.slane %v724_v45, 4 }
 0x210   : > { %v504_v48 = vadd.f32 %v503_v46, %v502_v44  ;;  %v726_v49 = vadd.f32 %v725_v47, %v724_v45 }
 0x212   : > { %v505_v50 = vrot.slane %v504_v48, 1  ;;  %v727_v51 = vrot.slane %v726_v49, 2 }
 0x214   : > { %v728_v52 = vadd.f32 %v727_v51, %v726_v49  ;;  %v506_v53 = vadd.f32 %v505_v50, %v504_v48  ;;  %v1466_v50 = vmov 2   ;;  %v1467_v51 = vmov 1  }
 0x215   : > { %1233 = vset.pattern.permute.xlu1 %v1466_v50  ;;  %1232 = vset.pattern.permute.xlu0 %v1467_v51 }
 0x216   : > { %v729_v54 = vrot.slane %v728_v52, 1  ;;  %v507_v55 = vmul.f32 %v506_v53, %v1731_v12 }
 0x218   : > { %509 = vrot.lane.b32.xlu1 %v507_v55, %s1465_s12  ;;  %v730_v56 = vadd.f32 %v729_v54, %v728_v52  ;;  %v1468_v52 = vmov 4  }
 0x21a   : > { %v731_v57 = vmul.f32 %v730_v56, %v1731_v12 }
 0x21c   : > { %733 = vrot.lane.b32.xlu0 %v731_v57, %s1465_s12 }
 0x28a   : > { %v510_v58 = vpop.permute.xlu1 %509 }
 0x28b   : > { %v513_v59 = vsel %vm512_vm2, %v510_v58, 0.0 }
 0x28c   : > { %514 = vadd.xlane.f32.xlu0 %v513_v59 }
 0x28e   : > { %v734_v60 = vpop.permute.xlu0 %733 }
 0x28f   : > { %v736_v61 = vsel %vm512_vm2, %v734_v60, 0.0 }
 0x290   : > { %737 = vadd.xlane.f32.xlu1 %v736_v61 }
 0x319   : > { %v515_v62 = vpop.xlane.xlu0 %514 }
 0x31a   : > { %v517_v63 = vmul.f32 0.0009765625, %v515_v62 }
 0x31c   : > { %v1747_v0 = vsub.f32 %v418_v17, %v517_v63  ;;  %v1749_v2 = vsub.f32 %v420_v20, %v517_v63  ;;  %v1751_v3 = vsub.f32 %v489_v25, %v517_v63  ;;  %v1753_v5 = vsub.f32 %v491_v29, %v517_v63 }
 0x31d   : > { %v738_v4 = vpop.xlane.xlu1 %737  ;;  %v1469_v63 = vmov 5  }
 0x31e   : > { %v739_v6 = vmul.f32 0.0009765625, %v738_v4  ;;  %v522_v7 = vmul.f32 %v1747_v0, %v1747_v0  ;;  %v523_v8 = vmul.f32 %v1749_v2, %v1749_v2  ;;  %v524_v9 = vmul.f32 %v1751_v3, %v1751_v3 }
 0x31f   : > { %v525_v15 = vmul.f32 %v1753_v5, %v1753_v5  ;;  %v1470_v4 = vmov 6  }
 0x320   : > { %v1761_v10 = vsub.f32 %v643_v26, %v739_v6  ;;  %v1763_v11 = vsub.f32 %v645_v30, %v739_v6  ;;  %v526_v13 = vadd.f32 %v523_v8, %v522_v7  ;;  %v1765_v14 = vsub.f32 %v714_v33, %v739_v6 }
 0x321   : > { %v1769_v17 = vsub.f32 %v716_v36, %v739_v6  ;;  %v1798_v6 = vld [vmem:[%s1887_s5] sm:$0x1] }
 0x322   : > { %v527_v16 = vadd.f32 %v526_v13, %v524_v9  ;;  %v744_v18 = vmul.f32 %v1761_v10, %v1761_v10  ;;  %v745_v19 = vmul.f32 %v1763_v11, %v1763_v11  ;;  %v746_v21 = vmul.f32 %v1765_v14, %v1765_v14 }
 0x323   : > { %v747_v23 = vmul.f32 %v1769_v17, %v1769_v17 }
 0x324   : > { %v528_v20 = vadd.f32 %v527_v16, %v525_v15  ;;  %v748_v22 = vadd.f32 %v745_v19, %v744_v18 }
 0x326   : > { %529 = vadd.xlane.f32.xlu0 %v528_v20  ;;  %v749_v24 = vadd.f32 %v748_v22, %v746_v21 }
 0x328   : > { %v750_v25 = vadd.f32 %v749_v24, %v747_v23 }
 0x32a   : > { %751 = vadd.xlane.f32.xlu0 %v750_v25 }
 0x3b3   : > { %v530_v26 = vpop.xlane.xlu0 %529 }
 0x3b4   : > { %v531_v27 = vmul.f32 %v530_v26, %v1731_v12 }
 0x3b6   : > { %v532_v28 = vsel %vm499_vm1, %v531_v27, 0.0 }
 0x3b7   : > { %v533_v29 = vrot.slane %v532_v28, 4  ;;  %v752_v30 = vpop.xlane.xlu0 %751 }
 0x3b8   : > { %v753_v31 = vmul.f32 %v752_v30, %v1731_v12 }
 0x3b9   : > { %v534_v32 = vadd.f32 %v533_v29, %v532_v28 }
 0x3ba   : > { %v754_v33 = vsel %vm499_vm1, %v753_v31, 0.0 }
 0x3bb   : > { %v535_v34 = vrot.slane %v534_v32, 2  ;;  %v755_v35 = vrot.slane %v754_v33, 4 }
 0x3bd   : > { %v536_v36 = vadd.f32 %v535_v34, %v534_v32  ;;  %v756_v37 = vadd.f32 %v755_v35, %v754_v33 }
 0x3bf   : > { %v537_v38 = vrot.slane %v536_v36, 1  ;;  %v757_v39 = vrot.slane %v756_v37, 2 }
 0x3c1   : > { %v758_v40 = vadd.f32 %v757_v39, %v756_v37  ;;  %v538_v41 = vadd.f32 %v537_v38, %v536_v36 }
 0x3c3   : > { %v759_v42 = vrot.slane %v758_v40, 1  ;;  %v539_v43 = vmul.f32 %v538_v41, %v1731_v12 }
 0x3c5   : > { %541 = vrot.lane.b32.xlu0 %v539_v43, %s1465_s12  ;;  %v760_v44 = vadd.f32 %v759_v42, %v758_v40 }
 0x3c7   : > { %v761_v45 = vmul.f32 %v760_v44, %v1731_v12 }
 0x3c9   : > { %763 = vrot.lane.b32.xlu1 %v761_v45, %s1465_s12  ;;  %s1378_s12 = scalar_lea.vmem %s1840_s18, 64 }
 0x3ca   : > { %p1379_p3 = scmp.ne.s32.totalorder %s1840_s18, %s1378_s12  ;;  %p1386_p9 = scmp.lt.s32.totalorder %s1384_s2, %s1378_s12 }
 0x3cc   : > { %p1380_p10 = pnand %p1379_p3, %p1911_p7  ;;  %p1387_p1 = por %p1386_p9, %p1385_p5 }
 0x3ce   : > { %p1381_p13 = pneg %p1380_p10 }
 0x3d0   : > { %p1388_p4 = pnand %p1387_p1, %p1381_p13 }
 0x437   : > { %v542_v46 = vpop.permute.xlu0 %541 }
 0x438   : > { %v544_v47 = vsel %vm512_vm2, %v542_v46, 0.0 }
 0x439   : > { %545 = vadd.xlane.f32.xlu0 %v544_v47 }
 0x43b   : > { %v764_v48 = vpop.permute.xlu1 %763 }
 0x43c   : > { %v766_v49 = vsel %vm512_vm2, %v764_v48, 0.0 }
 0x43d   : > { %767 = vadd.xlane.f32.xlu1 %v766_v49 }
 0x44e   : > { %561 = vperm.xlu1 %1233, %v1731_v12  }
 0x452   : > { %1234 = vset.pattern.permute.xlu1 %v1468_v52 }
 0x4c6   : > { %v546_v53 = vpop.xlane.xlu0 %545 }
 0x4c7   : > { %v547_v54 = vmul.f32 0.0009765625, %v546_v53 }
 0x4c9   : > { %v548_v55 = vadd.f32 1e-05, %v547_v54 }
 0x4ca   : > { %v768_v56 = vpop.xlane.xlu1 %767 }
 0x4cb   : > { %1240 = vrsqrt.f32 %v548_v55  ;;  %v769_v57 = vmul.f32 0.0009765625, %v768_v56 }
 0x4cd   : > { %v770_v58 = vadd.f32 1e-05, %v769_v57 }
 0x4ce   : > { %v562_v7 = vpop.permute.xlu1 %561 }
 0x4cf   : > { %1242 = vrsqrt.f32 %v770_v58 }
 0x4d5   : > { %v1241_v59 = vpop.eup %1240 }
 0x4d6   : > { %v550_v60 = vmul.f32 %v1241_v59, %v1731_v12 }
 0x4d8   : > { %553 = vperm.xlu0 %1232, %v550_v60  }
 0x4d9   : > { %v1243_v61 = vpop.eup %1242 }
 0x4da   : > { %v772_v62 = vmul.f32 %v1243_v61, %v1731_v12 }
 0x4dc   : > { %775 = vperm.xlu1 %1234, %v772_v62  }
 0x4e0   : > { %1235 = vset.pattern.permute.xlu1 %v1469_v63 }
 0x4e1   : > { %783 = vperm.xlu1 %1235, %v1731_v12  }
 0x4e5   : > { %1236 = vset.pattern.permute.xlu1 %v1470_v4 }
 0x4e6   : > { %803 = vperm.xlu1 %1236, %v1731_v12  }
 0x4ea   : > { %1237 = vset.pattern.permute.xlu1 %v1463_v1 }
 0x4eb   : > { %836 = vperm.xlu1 %1237, %v1798_v6  }
 0x4ef   : > { %1238 = vset.pattern.permute.xlu1 %v1466_v50 }
 0x557   : > { %v554_v8 = vpop.permute.xlu0 %553 }
 0x558   : > { %v556_v9 = vmul.f32 %v554_v8, %v1747_v0  ;;  %v557_v13 = vmul.f32 %v554_v8, %v1749_v2  ;;  %v558_v15 = vmul.f32 %v554_v8, %v1751_v3  ;;  %v559_v12 = vmul.f32 %v554_v8, %v1753_v5 }
 0x55a   : > { %v564_v18 = vadd.f32 %v562_v7, %v556_v9  ;;  %v565_v19 = vadd.f32 %v562_v7, %v557_v13  ;;  %v566_v20 = vadd.f32 %v562_v7, %v558_v15  ;;  %v567_v21 = vadd.f32 %v562_v7, %v559_v12 }
 0x55b   : > { %v776_v16 = vpop.permute.xlu1 %775 }
 0x55c   : > { %v778_v1 = vmul.f32 %v776_v16, %v1761_v10  ;;  %v779_v22 = vmul.f32 %v776_v16, %v1763_v11  ;;  %v780_v23 = vmul.f32 %v776_v16, %v1765_v14  ;;  %v781_v24 = vmul.f32 %v776_v16, %v1769_v17 }
 0x55d   : > { %v790_v27 = vmax.f32 %v564_v18, 0.0  ;;  %v791_v5 = vmax.f32 %v565_v19, 0.0  ;;  %v792_v28 = vmax.f32 %v566_v20, 0.0  ;;  %v793_v29 = vmax.f32 %v567_v21, 0.0 }
 0x55e   : > { %v839_v10 = vlaneseq }
 0x560   : > { %v784_v0 = vpop.permute.xlu1 %783  ;;  %v1812_v40 = vshrl.u32 %v839_v10, 7  ;;  %vm983_vm4 = vcmp.lt.s32.totalorder %v839_v10, 512 }
 0x561   : > { %v786_v25 = vadd.f32 %v784_v0, %v778_v1  ;;  %v787_v2 = vadd.f32 %v784_v0, %v779_v22  ;;  %v788_v26 = vadd.f32 %v784_v0, %v780_v23  ;;  %v789_v3 = vadd.f32 %v784_v0, %v781_v24 }
 0x562   : > { %v1815_v49 = vsub.s32 0, %v1812_v40 }
 0x563   : > { %v794_v30 = vmax.f32 %v786_v25, 0.0  ;;  %v795_v31 = vmax.f32 %v787_v2, 0.0  ;;  %v796_v32 = vmax.f32 %v788_v26, 0.0  ;;  %v797_v33 = vmax.f32 %v789_v3, 0.0 }
 0x565   : > { %v804_v34 = vpop.permute.xlu1 %803  ;;  %v798_v11 = vadd.f32 %v794_v30, %v790_v27  ;;  %v799_v35 = vadd.f32 %v795_v31, %v791_v5  ;;  %v800_v14 = vadd.f32 %v796_v32, %v792_v28  ;;  %v801_v36 = vadd.f32 %v797_v33, %v793_v29 }
 0x567   : > { %v806_v17 = vmul.f32 %v804_v34, %v798_v11  ;;  %v807_v37 = vmul.f32 %v804_v34, %v799_v35  ;;  %v808_v38 = vmul.f32 %v804_v34, %v800_v14  ;;  %v809_v39 = vmul.f32 %v804_v34, %v801_v36 }
 0x569   : > { %v810_v41 = vrot.slane %v806_v17, 4  ;;  %v816_v42 = vrot.slane %v807_v37, 4  ;;  %v822_v43 = vrot.slane %v808_v38, 4  ;;  %v828_v44 = vrot.slane %v809_v39, 4 }
 0x56a   : > { %v837_v55 = vpop.permute.xlu1 %836 }
 0x56b   : > { %v811_v45 = vadd.f32 %v810_v41, %v806_v17  ;;  %v817_v46 = vadd.f32 %v816_v42, %v807_v37  ;;  %v823_v47 = vadd.f32 %v822_v43, %v808_v38  ;;  %v829_v48 = vadd.f32 %v828_v44, %v809_v39 }
 0x56c   : > { %v842_v60 = vrot.slane %v837_v55, %v1815_v49 }
 0x56d   : > { %v812_v51 = vrot.slane %v811_v45, 2  ;;  %v818_v52 = vrot.slane %v817_v46, 2  ;;  %v824_v53 = vrot.slane %v823_v47, 2  ;;  %v830_v54 = vrot.slane %v829_v48, 2 }
 0x56f   : > { %v813_v56 = vadd.f32 %v812_v51, %v811_v45  ;;  %v819_v57 = vadd.f32 %v818_v52, %v817_v46  ;;  %v825_v58 = vadd.f32 %v824_v53, %v823_v47  ;;  %v831_v59 = vadd.f32 %v830_v54, %v829_v48 }
 0x571   : > { %v814_v61 = vrot.slane %v813_v56, 1  ;;  %v820_v62 = vrot.slane %v819_v57, 1  ;;  %v826_v63 = vrot.slane %v825_v58, 1  ;;  %v832_v4 = vrot.slane %v831_v59, 1 }
 0x573   : > { %v815_v7 = vadd.f32 %v814_v61, %v813_v56  ;;  %v821_v8 = vadd.f32 %v820_v62, %v819_v57  ;;  %v827_v9 = vadd.f32 %v826_v63, %v825_v58  ;;  %v833_v13 = vadd.f32 %v832_v4, %v831_v59 }
 0x575   : > { %v843_v15 = vadd.f32 %v842_v60, %v815_v7  ;;  %v844_v12 = vadd.f32 %v842_v60, %v821_v8  ;;  %v845_v16 = vadd.f32 %v842_v60, %v827_v9  ;;  %v846_v18 = vadd.f32 %v842_v60, %v833_v13 }
 0x577   : > { %v848_v19 = vsel %vm847_vm3, %v843_v15, 0.0  ;;  %v849_v20 = vsel %vm847_vm3, %v844_v12, 0.0  ;;  %v851_v1 = vsel %vm847_vm3, %v845_v16, 0.0  ;;  %v853_v23 = vsel %vm847_vm3, %v846_v18, 0.0 }
 0x578   : > { %v850_v21 = vadd.f32 %v849_v20, %v848_v19 }
 0x57a   : > { %v852_v22 = vadd.f32 %v851_v1, %v850_v21 }
 0x57c   : > { %v854_v24 = vadd.f32 %v853_v23, %v852_v22 }
 0x57e   : > { %855 = vadd.xlane.f32.xlu1 %v854_v24 }
 0x58f   : > { %917 = vperm.xlu1 %1238, %v1798_v6  }
 0x60b   : > { %v856_v0 = vpop.xlane.xlu1 %855 }
 0x60c   : > { %v857_v25 = vrot.slane %v856_v0, 4 }
 0x60e   : > { %v858_v2 = vadd.f32 %v857_v25, %v856_v0 }
 0x60f   : > { %v918_v54 = vpop.permute.xlu1 %917 }
 0x610   : > { %v859_v26 = vrot.slane %v858_v2, 2  ;;  %v923_v55 = vrot.slane %v918_v54, %v1815_v49 }
 0x612   : > { %v860_v3 = vadd.f32 %v859_v26, %v858_v2  ;;  %v1471_v26 = vmov 1966171168  }
 0x614   : > { %v861_v27 = vrot.slane %v860_v3, 1 }
 0x616   : > { %v862_v5 = vadd.f32 %v861_v27, %v860_v3  ;;  %v959_v3 = vunpack.c.l.s4 %v1471_v26 }
 0x618   : > { %1142 = vpush %v862_v5  ;;  %v960_v27 = vunpack.c.0.s8 %v959_v3 }
 0x649   : > { %s1143_s9 = spop %1142 }
 0x64a   : > { %s866_s10 = smul.f32 0.001953125, %s1143_s9 }
 0x64c   : > { %v867_v28 = vstv %s866_s10 }
 0x64d   : > { %v868_v29 = vsub.f32 %v843_v15, %v867_v28  ;;  %v869_v30 = vsub.f32 %v844_v12, %v867_v28  ;;  %v870_v31 = vsub.f32 %v845_v16, %v867_v28  ;;  %v871_v32 = vsub.f32 %v846_v18, %v867_v28 }
 0x64e   : > { %v963_v28 = vsub.s32 %v960_v27, %v1812_v40 }
 0x64f   : > { %v872_v33 = vmul.f32 %v868_v29, %v868_v29  ;;  %v873_v34 = vmul.f32 %v869_v30, %v869_v30  ;;  %v874_v11 = vmul.f32 %v870_v31, %v870_v31  ;;  %v875_v35 = vmul.f32 %v871_v32, %v871_v32 }
 0x651   : > { %v876_v14 = vsel %vm847_vm3, %v872_v33, 0.0  ;;  %v877_v36 = vsel %vm847_vm3, %v873_v34, 0.0  ;;  %v879_v37 = vsel %vm847_vm3, %v874_v11, 0.0  ;;  %v881_v39 = vsel %vm847_vm3, %v875_v35, 0.0 }
 0x652   : > { %v878_v17 = vadd.f32 %v877_v36, %v876_v14 }
 0x654   : > { %v880_v38 = vadd.f32 %v879_v37, %v878_v17 }
 0x656   : > { %v882_v41 = vadd.f32 %v881_v39, %v880_v38 }
 0x658   : > { %883 = vadd.xlane.f32.xlu0 %v882_v41 }
 0x66e   : > { %905 = vperm.xlu0 %1232, %v1798_v6  }
 0x672   : > { %1239 = vset.pattern.permute.xlu0 %v1466_v50 }
 0x6e5   : > { %v884_v42 = vpop.xlane.xlu0 %883 }
 0x6e6   : > { %v885_v43 = vrot.slane %v884_v42, 4 }
 0x6e8   : > { %v886_v44 = vadd.f32 %v885_v43, %v884_v42 }
 0x6ea   : > { %v887_v45 = vrot.slane %v886_v44, 2 }
 0x6ec   : > { %v888_v46 = vadd.f32 %v887_v45, %v886_v44 }
 0x6ed   : > { %v906_v53 = vpop.permute.xlu0 %905 }
 0x6ee   : > { %v889_v47 = vrot.slane %v888_v46, 1  ;;  %v911_v50 = vrot.slane %v906_v53, %v1815_v49 }
 0x6f0   : > { %v890_v48 = vadd.f32 %v889_v47, %v888_v46 }
 0x6f2   : > { %1144 = vpush %v890_v48 }
 0x723   : > { %s1145_s13 = spop %1144 }
 0x724   : > { %s894_s15 = smul.f32 0.001953125, %s1145_s13 }
 0x726   : > { %s895_s17 = sadd.f32 1e-05, %s894_s15 }
 0x728   : > { %v896_v51 = vstv %s895_s17 }
 0x729   : > { %1244 = vrsqrt.f32 %v896_v51 }
 0x733   : > { %v1245_v52 = vpop.eup %1244 }
 0x734   : > { %1146 = vpush %v1245_v52 }
 0x765   : > { %s1147_s26 = spop %1146 }
 0x766   : > { %v899_v6 = vstv %s1147_s26 }
 0x767   : > { %v900_v56 = vmul.f32 %v899_v6, %v868_v29  ;;  %v901_v57 = vmul.f32 %v899_v6, %v869_v30  ;;  %v902_v58 = vmul.f32 %v899_v6, %v870_v31  ;;  %v903_v59 = vmul.f32 %v899_v6, %v871_v32 }
 0x769   : > { %v912_v60 = vmul.f32 %v911_v50, %v900_v56  ;;  %v913_v61 = vmul.f32 %v911_v50, %v901_v57  ;;  %v914_v62 = vmul.f32 %v911_v50, %v902_v58  ;;  %v915_v63 = vmul.f32 %v911_v50, %v903_v59 }
 0x76b   : > { %v924_v4 = vadd.f32 %v923_v55, %v912_v60  ;;  %v925_v7 = vadd.f32 %v923_v55, %v913_v61  ;;  %v926_v8 = vadd.f32 %v923_v55, %v914_v62  ;;  %v927_v9 = vadd.f32 %v923_v55, %v915_v63 }
 0x76d   : > { %v928_v13 = vsub.f32 0.0, %v924_v4  ;;  %v929_v15 = vsub.f32 0.0, %v925_v7  ;;  %v930_v12 = vsub.f32 0.0, %v926_v8  ;;  %v931_v16 = vsub.f32 0.0, %v927_v9 }
 0x76f   : > { %v932_v18 = vmul.f32 1.442695, %v928_v13  ;;  %v934_v19 = vmul.f32 1.442695, %v929_v15  ;;  %v936_v20 = vmul.f32 1.442695, %v930_v12 }
 0x770   : > { %v938_v49 = vmul.f32 1.442695, %v931_v16 }
 0x771   : > { %1246 = vpow2.f32 %v932_v18 }
 0x772   : > { %1248 = vpow2.f32 %v934_v19 }
 0x773   : > { %1250 = vpow2.f32 %v936_v20 }
 0x774   : > { %1252 = vpow2.f32 %v938_v49 }
 0x77b   : > { %v1247_v21 = vpop.eup %1246 }
 0x77c   : > { %v1249_v1 = vpop.eup %1248  ;;  %v940_v22 = vadd.f32 1.0, %v1247_v21 }
 0x77d   : > { %v1251_v23 = vpop.eup %1250  ;;  %v941_v24 = vadd.f32 1.0, %v1249_v1 }
 0x77e   : > { %v1253_v0 = vpop.eup %1252  ;;  %v942_v25 = vadd.f32 1.0, %v1251_v23  ;;  %1254 = vrcp.f32 %v940_v22 }
 0x77f   : > { %v943_v2 = vadd.f32 1.0, %v1253_v0  ;;  %1256 = vrcp.f32 %v941_v24 }
 0x780   : > { %1258 = vrcp.f32 %v942_v25 }
 0x781   : > { %1260 = vrcp.f32 %v943_v2 }
 0x788   : > { %v1255_v5 = vpop.eup %1254 }
 0x789   : > { %v1257_v29 = vpop.eup %1256 }
 0x78a   : > { %v1259_v30 = vpop.eup %1258  ;;  %v956_v31 = vcombine.low %v1255_v5, %v1257_v29 }
 0x78b   : > { %v1261_v32 = vpop.eup %1260 }
 0x78c   : > { %v957_v33 = vcombine.low %v1259_v30, %v1261_v32  ;;  %v964_v34 = vrot.slane %v956_v31, %v963_v28 }
 0x78e   : > { %v971_v11 = vrot.slane %v957_v33, %v963_v28 }
 0x790   : > { %v972_v35 = vcombine.low %v964_v34, %v971_v11 }
 0x792   : > { %v979_v14 = vrot.slane %v972_v35, %v963_v28 }
 0x794   : > { %985 = vst.msk [vmem:[%s330_s7] sm:$0xf] %vm983_vm4, %v979_v14 }
 0x795   : > { %1391 = shalt.err (!%p1388_p4)
}
 0x796   : > { %s1392_s14 = scalar_lea.hbm %s1838_s27, 64  ;;  %s1396_s13 = scalar_lea.hbm %s1888_s6, 128 }
 0x797   : > { %p1393_p2 = scmp.ne.s32.totalorder %s1838_s27, %s1392_s14  ;;  %p1397_p11 = scmp.lt.u32.totalorder %s1838_s27, %s1888_s6 }
 0x798   : > { %p1398_p8 = scmp.lt.u32.totalorder %s1396_s13, %s1392_s14  ;;  %p1400_p3 = scmp.lt.u32.totalorder %s1392_s14, %s1838_s27 }
 0x799   : > { %p1394_p0 = pnand %p1393_p2, %p1911_p7 }
 0x79a   : > { %p1399_p12 = por %p1398_p8, %p1397_p11 }
 0x79b   : > { %p1395_p6 = pneg %p1394_p0 }
 0x79c   : > { %p1401_p10 = por %p1400_p3, %p1399_p12 }
 0x79e   : > { %p1402_p13 = pnand %p1401_p10, %p1395_p6 }
 0x7a0   : > { %1405 = shalt.err (!%p1402_p13)
}
 0x7a1   : > { %1160 = dma.vmem_to_hbm [thread:$0]  (%p1911_p7), %s1840_s18, 64, %s1838_s27, %s987_s19  }
 0x7a2 PF: > { %s1013_s26 = sand.u32 1, %s1444_s21   ;;  %p1912_p5 = scmp.ne.s32.totalorder %s1896_s28, 0 }
 0x7a3   : > { %p1913_p9 = scmp.ge.s32.totalorder %s1456_s24, 2  ;;  %s1014_s4 = scalar_lea.sflag [#allocation4], %s1013_s26 }
 0x7a5   : > { %p1177_p1 = pnand %p1913_p9, %p1912_p5 }
 0x7a7   : > { %1439 = dma.done.wait (!%p1177_p1), %s1014_s4, 64  }
 0x7a8   : > { %1441 = vsyncadd (!%p1177_p1), %s1014_s4, 4294967232  ;;  %s1914_s16 = sld [smem:[#allocation16_spill]]  ;;  %p23_p4 = scmp.ge.s32.totalorder %s1564_s11, 4  }
 0x7a9   : > { %s1915_s21 = smov %s1448_s22  ;;  %s1916_s22 = smov %s1452_s23 }
 0x7aa   : > { %s1918_s24 = smov %s1564_s11  ;;  %25 = sbr.rel (!%p23_p4) target bundleno = 11 (0xb), region = 110 }
 0x7ae   : > { %s1917_s23 = smov %s1914_s16 }
 0x7b1   :  { %1019 = vsyncpa [#allocation3], 1 }
 0x7b2   :  { %1021 = vsyncpa [#allocation3 + $0x1], 1 }
 0x7b3   :  { %1022 = vsyncpa [#allocation6], 1 }
 0x7b4   :  { %1024 = vsyncpa [#allocation6 + $0x1], 1 }
 0x7b5   :  { %1025 = vsyncpa [#allocation9], 1 }
 0x7b6   :  { %1026 = vsyncpa [#allocation4], 1 }
 0x7b7   :  { %1028 = vsyncpa [#allocation4 + $0x1], 1 }

</bundles_post_ra>
